<compile_context>
chip_gen: v5e
topology: v5e:2x2
jax: 0.10.0
libtpu: 0.0.40
codegen_flags: <defaults>
</compile_context>

<pallas_src>
import jax
import jax.numpy as jnp
from jax.experimental import pallas as pl
from jax.experimental.pallas import tpu as pltpu


def _conv_bn_relu_kernel(x_ref, b_ref, scale_ref, shift_ref, o_ref):
    # x_ref:     (H+2, (W+2)*Cin)   padded NHWC image, lane-collapsed
    # b_ref:     (3, (W+2)*Cin, L)  banded conv weights (L = W*Cout padded to 128k)
    # scale_ref: (1, L)  f32        BN scale, tiled per (w, co) lane
    # shift_ref: (1, L)  f32        BN shift, tiled per (w, co) lane
    # o_ref:     (H, L)             NHWC-flat output block (lane-dense)
    h = o_ref.shape[0]

    acc = jax.lax.dot_general(
        x_ref[0:h, :], b_ref[0],
        dimension_numbers=(((1,), (0,)), ((), ())),
        preferred_element_type=jnp.float32)
    for dy in (1, 2):  # static unroll; each tap is a cheap sublane-offset view
        acc = acc + jax.lax.dot_general(
            x_ref[dy:dy + h, :], b_ref[dy],
            dimension_numbers=(((1,), (0,)), ((), ())),
            preferred_element_type=jnp.float32)

    # f32 epilogue: BatchNorm (inference) + ReLU.
    y = jnp.maximum(acc * scale_ref[...] + shift_ref[...], 0.0)
    o_ref[...] = y.astype(o_ref.dtype)


def _round_up(x, m):
    return (x + m - 1) // m * m


def singlecov_layer(x_nchw, conv_w, gamma, beta, running_mean, running_var,
                    eps=1e-5):
    """x_nchw: (N, Cin, H, W); conv_w: (Cout, Cin, 3, 3) — PyTorch layouts."""
    n, cin, h, w = x_nchw.shape
    cout = conv_w.shape[0]
    wp = w + 2
    wpc = wp * cin
    l_out = _round_up(w * cout, 128)      # lane-dense (unmasked vst) output width
    dt = x_nchw.dtype
    itemsize = jnp.dtype(dt).itemsize

    # ---- wrapper-side XLA glue: layout, 'same' padding, banded weights ----
    x_nhwc = jnp.transpose(x_nchw, (0, 2, 3, 1))
    x_pad = jnp.pad(x_nhwc, ((0, 0), (1, 1), (1, 1), (0, 0)))
    x_blk = x_pad.reshape(n, h + 2, wpc)            # lane-collapse (W+2, Cin)

    # Banded weight: B[dy, wp*Cin+ci, w*Cout+co] = conv_w[co,ci,dy,wp-w], 0<=wp-w<3
    wp_idx = jnp.arange(wp)
    w_idx = jnp.arange(w)
    dx = wp_idx[:, None] - w_idx[None, :]           # (W+2, W)
    valid = (dx >= 0) & (dx < 3)
    dx_c = jnp.clip(dx, 0, 2)
    w_t = jnp.transpose(conv_w, (2, 3, 1, 0)).astype(jnp.float32)  # (3,3,Cin,Cout)
    band = jnp.where(valid[None, :, :, None, None], w_t[:, dx_c], 0.0)
    band = jnp.transpose(band, (0, 1, 3, 2, 4)).reshape(3, wpc, w * cout)
    band = jnp.pad(band, ((0, 0), (0, 0), (0, l_out - w * cout))).astype(dt)

    # BN (inference) folded to per-channel scale/shift, applied in f32 epilogue.
    scale = (gamma / jnp.sqrt(running_var + eps)).astype(jnp.float32)
    shift = (beta - running_mean * scale).astype(jnp.float32)
    scale_row = jnp.pad(jnp.tile(scale, w), (0, l_out - w * cout)).reshape(1, l_out)
    shift_row = jnp.pad(jnp.tile(shift, w), (0, l_out - w * cout)).reshape(1, l_out)

    cost = pl.CostEstimate(
        flops=2 * n * 3 * h * wpc * l_out,          # actual MXU MACs (incl. band zeros)
        transcendentals=0,
        bytes_accessed=int(x_blk.size) * itemsize + int(band.size) * itemsize
        + 2 * 4 * l_out + n * h * l_out * itemsize,
    )

    out_flat = pl.pallas_call(
        _conv_bn_relu_kernel,
        out_shape=jax.ShapeDtypeStruct((n, h, l_out), dt),
        grid=(n,),
        in_specs=[
            # one whole padded image per step (batch dim squeezed)
            pl.BlockSpec((None, h + 2, wpc), lambda b: (b, 0, 0)),
            # banded weights / BN rows: constant index maps -> DMA'd once
            pl.BlockSpec((3, wpc, l_out), lambda b: (0, 0, 0)),
            pl.BlockSpec((1, l_out), lambda b: (0, 0)),
            pl.BlockSpec((1, l_out), lambda b: (0, 0)),
        ],
        out_specs=pl.BlockSpec((None, h, l_out), lambda b: (b, 0, 0)),
        compiler_params=pltpu.CompilerParams(
            dimension_semantics=("parallel",)),
        cost_estimate=cost,
    )(x_blk, band, scale_row, shift_row)

    # un-pad lanes, NHWC -> NCHW (tiny XLA transpose)
    out = out_flat[:, :, : w * cout].reshape(n, h, w, cout)
    return jnp.transpose(out, (0, 3, 1, 2))


if __name__ == "__main__":
    key = jax.random.PRNGKey(0)
    k_x, k_w = jax.random.split(key)

    N, Cin, H, W = 2, 4, 16, 16
    Cout = 8

    x = jax.random.normal(k_x, (N, Cin, H, W), dtype=jnp.float32)
    conv_w = jax.random.normal(k_w, (Cout, Cin, 3, 3), dtype=jnp.float32) * 0.1

    # BatchNorm2d default-initialized parameters / running stats.
    gamma = jnp.ones((Cout,), jnp.float32)
    beta = jnp.zeros((Cout,), jnp.float32)
    running_mean = jnp.zeros((Cout,), jnp.float32)
    running_var = jnp.ones((Cout,), jnp.float32)

    out = singlecov_layer(x, conv_w, gamma, beta, running_mean, running_var)
    jax.block_until_ready(out)

    # sanity check against pure-JAX reference
    ref = jax.lax.conv_general_dilated(
        x, conv_w, window_strides=(1, 1), padding="SAME",
        dimension_numbers=("NCHW", "OIHW", "NCHW"))
    scale = gamma / jnp.sqrt(running_var + 1e-5)
    shift = beta - running_mean * scale
    ref = jnp.maximum(ref * scale[None, :, None, None]
                      + shift[None, :, None, None], 0.0)
    assert out.shape == (N, Cout, H, W)
    assert jnp.allclose(out, ref, atol=1e-4, rtol=1e-4)

    print("KERNEL_OK")
</pallas_src>

<mosaic_0001>
module attributes {stable_mosaic.version = 11 : i64} {
  func.func @_conv_bn_relu_kernel(%arg0: i32, %arg1: memref<1x18x72xf32, #tpu.memory_space<vmem>>, %arg2: memref<3x72x128xf32, #tpu.memory_space<vmem>>, %arg3: memref<1x128xf32, #tpu.memory_space<vmem>>, %arg4: memref<1x128xf32, #tpu.memory_space<vmem>>, %arg5: memref<1x16x128xf32, #tpu.memory_space<vmem>>) attributes {dimension_semantics = [#tpu.dimension_semantics<parallel>], iteration_bounds = array<i64: 2>, scalar_prefetch = 0 : i64, scratch_operands = 0 : i64, tpu.core_type = #tpu.core_type<tc>, window_params = [{transform_indices = @transform_0, window_bounds = array<i64: 1, 18, 72>}, {pipeline_mode = #tpu.pipeline_mode<synchronous>, transform_indices = @transform_1, window_bounds = array<i64: 3, 72, 128>}, {pipeline_mode = #tpu.pipeline_mode<synchronous>, transform_indices = @transform_2, window_bounds = array<i64: 1, 128>}, {pipeline_mode = #tpu.pipeline_mode<synchronous>, transform_indices = @transform_3, window_bounds = array<i64: 1, 128>}, {transform_indices = @transform_4, window_bounds = array<i64: 1, 16, 128>}]} {
    %c0 = arith.constant 0 : index
    %c0_0 = arith.constant 0 : index
    %c0_1 = arith.constant 0 : index
    %0 = vector.load %arg1[%c0, %c0_0, %c0_1] : memref<1x18x72xf32, #tpu.memory_space<vmem>>, vector<1x16x72xf32>
    %1 = vector.shape_cast %0 : vector<1x16x72xf32> to vector<16x72xf32>
    %c0_2 = arith.constant 0 : index
    %c0_3 = arith.constant 0 : index
    %c0_4 = arith.constant 0 : index
    %2 = vector.load %arg2[%c0_2, %c0_3, %c0_4] : memref<3x72x128xf32, #tpu.memory_space<vmem>>, vector<1x72x128xf32>
    %3 = vector.shape_cast %2 : vector<1x72x128xf32> to vector<72x128xf32>
    %cst = arith.constant dense<0.000000e+00> : vector<16x128xf32>
    %4 = tpu.matmul %1, %3, %cst {dimension_numbers = #tpu.dot_dimension_numbers<[1], [0], [0], [1], [0, 0, 1, 1], [], []>} : vector<16x72xf32>, vector<72x128xf32>, vector<16x128xf32> -> vector<16x128xf32>
    %c0_5 = arith.constant 0 : index
    %c1 = arith.constant 1 : index
    %c0_6 = arith.constant 0 : index
    %5 = vector.load %arg1[%c0_5, %c1, %c0_6] : memref<1x18x72xf32, #tpu.memory_space<vmem>>, vector<1x16x72xf32>
    %6 = vector.shape_cast %5 : vector<1x16x72xf32> to vector<16x72xf32>
    %c1_7 = arith.constant 1 : index
    %c0_8 = arith.constant 0 : index
    %c0_9 = arith.constant 0 : index
    %7 = vector.load %arg2[%c1_7, %c0_8, %c0_9] : memref<3x72x128xf32, #tpu.memory_space<vmem>>, vector<1x72x128xf32>
    %8 = vector.shape_cast %7 : vector<1x72x128xf32> to vector<72x128xf32>
    %cst_10 = arith.constant dense<0.000000e+00> : vector<16x128xf32>
    %9 = tpu.matmul %6, %8, %cst_10 {dimension_numbers = #tpu.dot_dimension_numbers<[1], [0], [0], [1], [0, 0, 1, 1], [], []>} : vector<16x72xf32>, vector<72x128xf32>, vector<16x128xf32> -> vector<16x128xf32>
    %10 = arith.addf %4, %9 : vector<16x128xf32>
    %c0_11 = arith.constant 0 : index
    %c2 = arith.constant 2 : index
    %c0_12 = arith.constant 0 : index
    %11 = vector.load %arg1[%c0_11, %c2, %c0_12] : memref<1x18x72xf32, #tpu.memory_space<vmem>>, vector<1x16x72xf32>
    %12 = vector.shape_cast %11 : vector<1x16x72xf32> to vector<16x72xf32>
    %c2_13 = arith.constant 2 : index
    %c0_14 = arith.constant 0 : index
    %c0_15 = arith.constant 0 : index
    %13 = vector.load %arg2[%c2_13, %c0_14, %c0_15] : memref<3x72x128xf32, #tpu.memory_space<vmem>>, vector<1x72x128xf32>
    %14 = vector.shape_cast %13 : vector<1x72x128xf32> to vector<72x128xf32>
    %cst_16 = arith.constant dense<0.000000e+00> : vector<16x128xf32>
    %15 = tpu.matmul %12, %14, %cst_16 {dimension_numbers = #tpu.dot_dimension_numbers<[1], [0], [0], [1], [0, 0, 1, 1], [], []>} : vector<16x72xf32>, vector<72x128xf32>, vector<16x128xf32> -> vector<16x128xf32>
    %16 = arith.addf %10, %15 : vector<16x128xf32>
    %c0_17 = arith.constant 0 : index
    %c0_18 = arith.constant 0 : index
    %17 = vector.load %arg3[%c0_17, %c0_18] : memref<1x128xf32, #tpu.memory_space<vmem>>, vector<1x128xf32>
    %18 = vector.broadcast %17 : vector<1x128xf32> to vector<16x128xf32>
    %19 = arith.mulf %16, %18 : vector<16x128xf32>
    %c0_19 = arith.constant 0 : index
    %c0_20 = arith.constant 0 : index
    %20 = vector.load %arg4[%c0_19, %c0_20] : memref<1x128xf32, #tpu.memory_space<vmem>>, vector<1x128xf32>
    %21 = vector.broadcast %20 : vector<1x128xf32> to vector<16x128xf32>
    %22 = arith.addf %19, %21 : vector<16x128xf32>
    %cst_21 = arith.constant 0.000000e+00 : f32
    %23 = vector.broadcast %cst_21 : f32 to vector<16x128xf32>
    %24 = arith.maximumf %22, %23 : vector<16x128xf32>
    %c0_22 = arith.constant 0 : index
    %c0_23 = arith.constant 0 : index
    %c0_24 = arith.constant 0 : index
    %25 = vector.load %arg5[%c0_22, %c0_23, %c0_24] : memref<1x16x128xf32, #tpu.memory_space<vmem>>, vector<1x16x128xf32>
    %26 = vector.shape_cast %25 : vector<1x16x128xf32> to vector<16x128xf32>
    %27 = vector.shape_cast %24 : vector<16x128xf32> to vector<1x16x128xf32>
    tpu.vector_store %arg5[%c0_22, %c0_23, %c0_24], %27 {strides = array<i32>} : memref<1x16x128xf32, #tpu.memory_space<vmem>>, vector<1x16x128xf32>,
    return
  }
  func.func @transform_0(%arg0: i32) -> (i32, i32, i32) {
    %c0_i32 = arith.constant 0 : i32
    %c0_i32_0 = arith.constant 0 : i32
    %c0_i32_1 = arith.constant 0 : i32
    return %arg0, %c0_i32, %c0_i32_0 : i32, i32, i32
  }
  func.func @transform_1(%arg0: i32) -> (i32, i32, i32) {
    %c0_i32 = arith.constant 0 : i32
    %c0_i32_0 = arith.constant 0 : i32
    %c0_i32_1 = arith.constant 0 : i32
    %c0_i32_2 = arith.constant 0 : i32
    return %c0_i32, %c0_i32_0, %c0_i32_1 : i32, i32, i32
  }
  func.func @transform_2(%arg0: i32) -> (i32, i32) {
    %c0_i32 = arith.constant 0 : i32
    %c0_i32_0 = arith.constant 0 : i32
    %c0_i32_1 = arith.constant 0 : i32
    return %c0_i32, %c0_i32_0 : i32, i32
  }
  func.func @transform_3(%arg0: i32) -> (i32, i32) {
    %c0_i32 = arith.constant 0 : i32
    %c0_i32_0 = arith.constant 0 : i32
    %c0_i32_1 = arith.constant 0 : i32
    return %c0_i32, %c0_i32_0 : i32, i32
  }
  func.func @transform_4(%arg0: i32) -> (i32, i32, i32) {
    %c0_i32 = arith.constant 0 : i32
    %c0_i32_0 = arith.constant 0 : i32
    %c0_i32_1 = arith.constant 0 : i32
    return %arg0, %c0_i32, %c0_i32_0 : i32, i32, i32
  }
}

</mosaic_0001>

<bundles_post_ra>
// kernel: tpu_custom_call.1
= control target key start
LH: loop header
LB: loop body
LE: loop exit
PB: predicated region body
PF: predicated region fallthrough
CT: control target
= control target key end

     0   :  { %9 = vsyncpa [#allocation3], 0  ;;  %s770_s0 = inlined_call_operand.vmem [shape: f32[2,18,72], index: 0, kind: input, shape index: {}]   ;;  %s771_s1 = inlined_call_operand.hbm [shape: f32[3,72,128], index: 1, kind: input, shape index: {}]   ;;  %s772_s2 = inlined_call_operand.vmem [shape: f32[1,128], index: 2, kind: input, shape index: {}]   ;;  %s773_s3 = inlined_call_operand.vmem [shape: f32[1,128], index: 3, kind: input, shape index: {}]   ;;  %s774_s4 = inlined_call_operand.hbm [shape: f32[2,16,128], index: 4, kind: output, shape index: {}]  }
   0x1   :  { %10 = vsyncpa [#allocation4], 0 }
   0x2   :  { %12 = vsyncpa [#allocation4 + $0x1], 0  ;;  %s658_s15 = smov 0   ;;  %s660_s16 = smov 0  }
   0x3   :  { %s662_s17 = smov 0   ;;  %s664_s18 = smov 0  }
   0x4 LB: > { %s679_s19 = sadd.s32 4294967295, %s626_s18   ;;  %s444_s20 = sadd.s32 4294967294, %s626_s18   ;;  %s626_s18 = sphi %s664_s18, %s780_s18   ;;  %s622_s17 = sphi %s662_s17, %s779_s17   ;;  %s618_s16 = sphi %s660_s16, %s778_s16   ;;  %s614_s15 = sphi %s658_s15, %s777_s15  }
   0x5   : > { %s683_s21 = sadd.s32 1, %s626_s18   ;;  %s114_s22 = sadd.s32 1, %s622_s17 }
   0x6   : > { %s111_s23 = ssub.s32 %s626_s18, %s683_s21  ;;  %p124_p0 = scmp.ne.s32.totalorder %s622_s17, %s618_s16 }
   0x7   : > { %p112_p1 = scmp.eq.s32.totalorder %s111_s23, 0  ;;  %p125_p2 = scmp.eq.s32.totalorder %s679_s19, 1 }
   0x8   : > { %p130_p3 = scmp.ne.s32.totalorder %s618_s16, %s614_s15  ;;  %p131_p4 = scmp.eq.s32.totalorder %s444_s20, 1 }
   0x9   : > { %s694_s24 = scalar_select %p112_p1, %s622_s17, %s114_s22  }
   0xa   : > { %p696_p5 = por %p125_p2, %p124_p0  ;;  %p700_p6 = por %p131_p4, %p130_p3 }
   0xb   : > { %p445_p7 = scmp.ge.s32.totalorder %s626_s18, 1  ;;  %p138_p8 = scmp.lt.s32.totalorder %s626_s18, 3 }
   0xc   : > { %p488_p9 = scmp.eq.s32.totalorder %s679_s19, 0  ;;  %s149_s29 = sshll.u32 %s771_s1, 4  ;;  %s150_s29 = int_to_ptr.hbm [resolvable:$true] %s149_s29 }
   0xd   : > { %p139_p10 = pnand %p445_p7, %p138_p8  ;;  %s628_s30 = smov [#allocation2]  }
   0xe   : > { %s151_s5 = sshll.u32 %s628_s30, 4  ;;  %s629_s6 = smov 128   ;;  %s152_s5 = int_to_ptr.vmem [resolvable:$true] %s151_s5 }
   0xf   : > { %p480_p11 = pneg %p139_p10  ;;  %s630_s7 = smov 8  }
  0x10   : > { %181 = sbr.rel (%p139_p10) target bundleno = 192 (0xc0), region = 36 }
  0x11   : > { %p481_p12 = pnand %p488_p9, %p480_p11 }
  0x13   : > { %483 = dma.hbm_to_vmem [thread:$0]  (!%p481_p12), %s150_s29, 3456, %s152_s5, [#allocation3], %s629_s6, %s629_s6, %s630_s7  }
  0x15   : > { %605 = dma.done.wait (%p488_p9), [#allocation3], 3456  }
  0x16   : > { %607 = vsyncadd (%p488_p9), [#allocation3], 4294963840  ;;  %v306_v0 = vld [vmem:[#allocation2 + $0xd0] sm:$0xff]  ;;  %v305_v1 = vld [vmem:[#allocation2 + $0xc8] sm:$0xff]  ;;  %p208_p13 = scmp.lt.s32.totalorder %s679_s19, 1  ;;  %vm236_vm0 = vcmask 588800  }
  0x17   : > { %v235_v2 = vld [vmem:[#allocation2 + $0x88] sm:$0xff]  ;;  %320 = vmatpush.msra.mxu2 %v306_v0  ;;  %v223_v3 = vld [vmem:[#allocation2 + $0x40] sm:$0xff]  ;;  %v222_v6 = vld [vmem:[#allocation2 + $0x38] sm:$0xff]  ;;  %s205_s20 = sand.u32 1, %s618_s16   ;;  %s463_s28 = sshll.u32 %s679_s19, 4 }
  0x18   : > { %250 = vmatpush.msra.mxu0 %v235_v2  ;;  %v234_v4 = vld [vmem:[#allocation2 + $0x80] sm:$0xff]  ;;  %279 = vmatpush.msra.mxu1 %v223_v3  ;;  %v233_v7 = vld [vmem:[#allocation2 + $0x78] sm:$0xff]  ;;  %v221_v8 = vld [vmem:[#allocation2 + $0x30] sm:$0xff]  ;;  %s720_s8 = scalar_select %p208_p13, %s679_s19, 1 }
  0x19   : > { %v304_v5 = vld [vmem:[#allocation2 + $0xc0] sm:$0xff]  ;;  %464 = vmatpush.msra.mxu3 %v235_v2  ;;  %321 = vmatpush.msra.mxu2 %v305_v1  ;;  %v303_v9 = vld [vmem:[#allocation2 + $0xb8] sm:$0xff]  ;;  %v232_v10 = vld [vmem:[#allocation2 + $0x70] sm:$0xff]  ;;  %s450_s27 = sshll.u32 %s205_s20, 4  ;;  %s366_s5 = scalar_lea.hbm %s774_s4, %s463_s28 }
  0x1a   : > { %251 = vmatpush.msra.mxu0 %v234_v4  ;;  %280 = vmatpush.msra.mxu1 %v222_v6  ;;  %v220_v11 = vld [vmem:[#allocation2 + $0x28] sm:$0xff]  ;;  %v302_v12 = vld [vmem:[#allocation2 + $0xb0] sm:$0xff]  ;;  %v219_v14 = vld [vmem:[#allocation2 + $0x20] sm:$0xff]  ;;  %s473_s9 = smul.u32 24, %s720_s8  ;;  %s207_s6 = scalar_lea.vmem [#allocation5], %s450_s27 }
  0x1b   : > { %465 = vmatpush.msra.mxu3 %v234_v4  ;;  %322 = vmatpush.msra.mxu2 %v304_v5  ;;  %v231_v13 = vld [vmem:[#allocation2 + $0x68] sm:$0xff]  ;;  %v230_v16 = vld [vmem:[#allocation2 + $0x60] sm:$0xff]  ;;  %v218_v17 = vld [vmem:[#allocation2 + $0x18] sm:$0xff]  ;;  %s367_s7 = sshll.u32 %s207_s6, 4  ;;  %s369_s8 = sshll.u32 %s366_s5, 4  ;;  %s368_s7 = int_to_ptr.vmem [resolvable:$true] %s367_s7  ;;  %s370_s8 = int_to_ptr.hbm [resolvable:$true] %s369_s8 }
  0x1c   : > { %252 = vmatpush.msra.mxu0 %v233_v7  ;;  %281 = vmatpush.msra.mxu1 %v221_v8  ;;  %v301_v15 = vld [vmem:[#allocation2 + $0xa8] sm:$0xff]  ;;  %v300_v18 = vld [vmem:[#allocation2 + $0xa0] sm:$0xff]  ;;  %v229_v19 = vld [vmem:[#allocation2 + $0x58] sm:$0xff]  ;;  %s212_s12 = scalar_lea.vmem %s770_s0, %s473_s9  ;;  %s355_s9 = scalar_lea.sflag [#allocation4], %s205_s20 }
  0x1d   : > { %466 = vmatpush.msra.mxu3 %v233_v7  ;;  %323 = vmatpush.msra.mxu2 %v303_v9  ;;  %v217_v20 = vld [vmem:[#allocation2 + $0x10] sm:$0xff]  ;;  %v299_v21 = vld [vmem:[#allocation2 + $0x98] sm:$0xff]  ;;  %v216_v23 = vld [vmem:[#allocation2 + $0x8] sm:$0xff]  ;;  %s574_s19 = sshra.s32 %s370_s8, 4  ;;  %s580_s13 = scalar_lea.hbm %s774_s4, 32  ;;  %s575_s19 = int_to_ptr.hbm [resolvable:$true] %s574_s19 }
  0x1e   : > { %253 = vmatpush.msra.mxu0 %v232_v10  ;;  %282 = vmatpush.msra.mxu1 %v220_v11  ;;  %v228_v22 = vld [vmem:[#allocation2 + $0x50] sm:$0xff]  ;;  %v227_v25 = vld [vmem:[#allocation2 + $0x48] sm:$0xff]  ;;  %v215_v27 = vld [vmem:[#allocation2] sm:$0xff]  ;;  %s576_s10 = scalar_lea.hbm %s575_s19, 16  ;;  %p581_p3 = scmp.lt.s32.totalorder %s575_s19, %s774_s4 }
  0x1f   : > { %467 = vmatpush.msra.mxu3 %v232_v10  ;;  %324 = vmatpush.msra.mxu2 %v302_v12  ;;  %v298_v24 = vld [vmem:[#allocation2 + $0x90] sm:$0xff]  ;;  %v295_v26 = vld [vmem:[%s212_s12 + $0x2] sm:$0xff]  ;;  %v528_v36 = vld [vmem:[%s772_s2] ss:$0 sm:$0xff]  ;;  %p577_p0 = scmp.ne.s32.totalorder %s575_s19, %s576_s10  ;;  %p582_p4 = scmp.lt.s32.totalorder %s580_s13, %s576_s10 }
  0x20   : > { %254 = vmatpush.msra.mxu0 %v231_v13  ;;  %283 = vmatpush.msra.mxu1 %v219_v14  ;;  %v224_v28 = vld [vmem:[%s212_s12 + $0x1] sm:$0xff]  ;;  %v225_v30 = vld [vmem:[%s212_s12 + $0x9] sm:$0xff]  ;;  %v529_v39 = vld [vmem:[%s773_s3] ss:$0 sm:$0xff] }
  0x21   : > { %468 = vmatpush.msra.mxu3 %v231_v13  ;;  %325 = vmatpush.msra.mxu2 %v301_v15  ;;  %v213_v29 = vld [vmem:[%s212_s12] sm:$0xff]  ;;  %v296_v31 = vld [vmem:[%s212_s12 + $0xa] sm:$0xff]  ;;  %p578_p1 = pnand %p577_p0, %p696_p5  ;;  %p583_p7 = por %p582_p4, %p581_p3 }
  0x22   : > { %255 = vmatpush.msra.mxu0 %v230_v16  ;;  %284 = vmatpush.msra.mxu1 %v218_v17  ;;  %v214_v32 = vld [vmem:[%s212_s12 + $0x8] sm:$0xff] }
  0x23   : > { %469 = vmatpush.msra.mxu3 %v230_v16  ;;  %326 = vmatpush.msra.mxu2 %v300_v18  ;;  %p579_p2 = pneg %p578_p1 }
  0x24   : > { %256 = vmatpush.msra.mxu0 %v229_v19  ;;  %285 = vmatpush.msra.mxu1 %v217_v20 }
  0x25   : > { %470 = vmatpush.msra.mxu3 %v229_v19  ;;  %327 = vmatpush.msra.mxu2 %v299_v21  ;;  %p584_p8 = pnand %p583_p7, %p579_p2 }
  0x26   : > { %257 = vmatpush.msra.mxu0 %v228_v22  ;;  %286 = vmatpush.msra.mxu1 %v216_v23 }
  0x27   : > { %471 = vmatpush.msra.mxu3 %v228_v22  ;;  %328 = vmatpush.msra.mxu2 %v298_v24 }
  0x28   : > { %258 = vmatpush.msra.mxu0 %v227_v25  ;;  %456 = vmatmul.msk.f32.vlgmr.msra.gmra.mxu2 %vm236_vm0, %v295_v26 }
  0x29   : > { %287 = vmatpush.msra.mxu1 %v215_v27  ;;  %452 = vmatmul.msk.f32.vlgmr.msra.gmra.mxu0 %vm236_vm0, %v224_v28 }
  0x2a   : > { %454 = vmatmul.msk.f32.vlgmr.msra.gmra.mxu1 %vm236_vm0, %v213_v29  ;;  %472 = vmatpush.msra.mxu3 %v227_v25 }
  0x2b   : > { %453 = vmatmul.msk.f32.vlgmr.msra.gmra.mxu3 %vm236_vm0, %v225_v30 }
  0x30   : > { %457 = vmatmul.msk.f32.gmra.mxu2 %vm236_vm0, %v296_v31 }
  0x32   : > { %455 = vmatmul.msk.f32.gmra.mxu1 %vm236_vm0, %v214_v32 }
  0xa6   : > { %v260_v33 = vpop.f32.mrf.mxu0 }
  0xa7   : > { %v289_v34 = vpop.f32.mrf.mxu1 }
  0xa8   : > { %v290_v35 = vadd.f32 %v289_v34, %v260_v33 }
  0xab   : > { %v330_v37 = vpop.f32.mrf.mxu2 }
  0xac   : > { %v336_v38 = vadd.f32 %v330_v37, %v290_v35 }
  0xae   : > { %v342_v40 = vmul.f32 %v528_v36, %v336_v38  ;;  %v263_v41 = vpop.f32.mrf.mxu3 }
  0xaf   : > { %v292_v42 = vpop.f32.mrf.mxu1 }
  0xb0   : > { %v348_v43 = vadd.f32 %v529_v39, %v342_v40  ;;  %v293_v44 = vadd.f32 %v292_v42, %v263_v41 }
  0xb2   : > { %v350_v45 = vmax.f32 %v348_v43, 0.0 }
  0xb3   : > { %v333_v46 = vpop.f32.mrf.mxu2 }
  0xb4   : > { %352 = vst [vmem:[%s207_s6] sm:$0xff] %v350_v45  ;;  %v337_v47 = vadd.f32 %v333_v46, %v293_v44 }
  0xb6   : > { %v343_v48 = vmul.f32 %v528_v36, %v337_v47 }
  0xb8   : > { %v349_v49 = vadd.f32 %v529_v39, %v343_v48 }
  0xba   : > { %v351_v50 = vmax.f32 %v349_v49, 0.0 }
  0xbc   : > { %353 = vst [vmem:[%s207_s6 + $0x8] sm:$0xff] %v351_v50 }
  0xbd   : > { %587 = shalt.err (!%p584_p8)
}
  0xbe   : > { %s631_s20 = smov 128   ;;  %s632_s23 = smov 8  }
  0xbf   : > { %478 = dma.vmem_to_hbm [thread:$0]  (%p696_p5), %s368_s7, 256, %s370_s8, %s355_s9, %s631_s20, %s631_s20, %s632_s23  }
  0xc0 PF: > { %p490_p9 = scmp.ge.s32.totalorder %s626_s18, 2  ;;  %s384_s27 = sand.u32 1, %s614_s15  }
  0xc1   : > { %s385_s28 = scalar_lea.sflag [#allocation4], %s384_s27 }
  0xc2   : > { %p485_p10 = pnand %p490_p9, %p700_p6 }
  0xc4   : > { %p486_p11 = pneg %p485_p10 }
  0xc6   : > { %609 = dma.done.wait (%p486_p11), %s385_s28, 256  }
  0xc7   : > { %611 = vsyncadd (%p486_p11), %s385_s28, 4294967040  ;;  %p15_p12 = scmp.ge.s32.totalorder %s683_s21, 4   ;;  %s777_s15 = smov %s618_s16 }
  0xc8   : > { %s778_s16 = smov %s622_s17  ;;  %s779_s17 = smov %s694_s24 }
  0xc9   : > { %s780_s18 = smov %s683_s21  ;;  %17 = sbr.rel (!%p15_p12) target bundleno = 4 (0x4), region = 78 }
  0xce   :  { %391 = vsyncpa [#allocation3], 1 }
  0xcf   :  { %393 = vsyncpa [#allocation3 + $0x1], 1 }
  0xd0   :  { %394 = vsyncpa [#allocation4], 1 }
  0xd1   :  { %396 = vsyncpa [#allocation4 + $0x1], 1 }

</bundles_post_ra>
